<compile_context>
chip_gen: v6e
topology: v6e:2x2x1
jax: 0.10.0
libtpu: 0.0.40
codegen_flags: <defaults>
</compile_context>

<pallas_src>
import functools

import jax
import jax.numpy as jnp
from jax import lax
from jax.experimental import pallas as pl
from jax.experimental.pallas import tpu as pltpu

LANES = 128                 # lane width
SUB = 8                     # f32 sublane tile (partials are always f32)
MAX_BLOCK_ROWS = 8192       # 8192*128*4B = 4 MiB f32 / input / block
VMEM_LIMIT_BYTES = 32 * 1024 * 1024   # 2 inputs * 2 bufs * 4 MiB = 16 MiB + headroom


def _round_up(a, b):
    return (a + b - 1) // b * b


def _sublane_pack(dtype):
    # Packed-sublane multiple: 8 for 4-byte, 16 for 2-byte, 32 for 1-byte.
    return max(SUB, 32 // jnp.dtype(dtype).itemsize)


def _grid_semantics():
    """'parallel' everywhere; CORE_PARALLEL on v7x so both TCs stream HBM."""
    try:
        kind = jax.devices()[0].device_kind.lower()
    except Exception:  # pragma: no cover - defensive
        kind = ""
    if "7" in kind:  # TPU v7x: 2 TensorCores per chip
        return (getattr(pltpu, "CORE_PARALLEL", "parallel"),)
    return ("parallel",)


def _bce_partial_kernel(x_ref, t_ref, p_ref, *, total, block_rows, num_blocks):
    """Stable BCE-with-logits reduced to a lane-dense (1,8,128) partial sum.

    loss = max(x, 0) - x * t + log1p(exp(-|x|))     (torch's elementwise formula)
    """
    x = x_ref[...].astype(jnp.float32)
    t = t_ref[...].astype(jnp.float32)
    loss = jnp.maximum(x, 0.0) - x * t + jnp.log1p(jnp.exp(-jnp.abs(x)))

    i = pl.program_id(0)

    @pl.when(i != num_blocks - 1)
    def _():
        # Interior blocks are fully valid: reduce only the leading reshape
        # axis (vreg-wise VPU adds, no cross-lane XLU work per step).
        p_ref[...] = jnp.sum(loss.reshape(1, -1, SUB, LANES), axis=1)

    @pl.when(i == num_blocks - 1)
    def _():
        # Ragged tail lives entirely in the last block: lane pad (<128 elems),
        # sublane-row pad (tiny inputs) and grid-overrun rows all have
        # idx >= total.  Select AFTER computing loss so garbage/NaN from
        # out-of-bounds rows cannot leak into the sum.
        # int32 index math: fine for < 2**31 elements.
        r = lax.broadcasted_iota(jnp.int32, loss.shape, 0)
        c = lax.broadcasted_iota(jnp.int32, loss.shape, 1)
        idx = (i * block_rows + r) * LANES + c
        masked = jnp.where(idx < total, loss, 0.0)
        p_ref[...] = jnp.sum(masked.reshape(1, -1, SUB, LANES), axis=1)


def binary_label_loss(outputs, targets, *, xla_fallback_below=0):
    """JAX/Pallas equivalent of BinaryLabel.forward(outputs, targets)."""
    assert outputs.shape == targets.shape
    total = int(outputs.size)
    if total == 0:
        return jnp.float32(jnp.nan)  # torch: mean of empty loss is nan
    if total < xla_fallback_below:
        # Optional plain-XLA path for tiny inputs where pallas_call fixed
        # overhead dominates.  Disabled by default so the kernel always runs.
        return _reference(outputs, targets)

    x = jnp.ravel(outputs)
    t = jnp.ravel(targets)

    rows = pl.cdiv(total, LANES)
    lane_pad = rows * LANES - total
    if lane_pad:
        # Only unaligned sizes (total % 128 != 0) pay this copy, and the pad
        # is < 128 elements; the in-kernel mask zeroes its contribution.
        x = jnp.concatenate([x, jnp.zeros((lane_pad,), dtype=x.dtype)])
        t = jnp.concatenate([t, jnp.zeros((lane_pad,), dtype=t.dtype)])

    # Free reshape of contiguous data to a lane-dense slab (no HBM copy).
    x2 = x.reshape(rows, LANES)
    t2 = t.reshape(rows, LANES)

    pack = max(_sublane_pack(x2.dtype), _sublane_pack(t2.dtype))
    block_rows = min(MAX_BLOCK_ROWS, _round_up(rows, pack))

    if rows < block_rows:
        # Single-block tiny input: pad rows so the block never exceeds the
        # array extent.  Negligible cost at this size; mask handles the rows.
        row_pad = block_rows - rows
        x2 = jnp.concatenate([x2, jnp.zeros((row_pad, LANES), dtype=x2.dtype)])
        t2 = jnp.concatenate([t2, jnp.zeros((row_pad, LANES), dtype=t2.dtype)])
        rows = block_rows

    num_blocks = pl.cdiv(rows, block_rows)

    kernel = functools.partial(
        _bce_partial_kernel,
        total=total, block_rows=block_rows, num_blocks=num_blocks,
    )

    bytes_accessed = (total * (x2.dtype.itemsize + t2.dtype.itemsize)
                      + num_blocks * SUB * LANES * 4)

    partials = pl.pallas_call(
        kernel,
        out_shape=jax.ShapeDtypeStruct((num_blocks, SUB, LANES), jnp.float32),
        grid=(num_blocks,),
        in_specs=[
            pl.BlockSpec((block_rows, LANES), lambda i: (i, 0)),
            pl.BlockSpec((block_rows, LANES), lambda i: (i, 0)),
        ],
        out_specs=pl.BlockSpec((1, SUB, LANES), lambda i: (i, 0, 0)),
        compiler_params=pltpu.CompilerParams(
            dimension_semantics=_grid_semantics(),
            vmem_limit_bytes=VMEM_LIMIT_BYTES,
        ),
        cost_estimate=pl.CostEstimate(
            flops=8 * total,
            transcendentals=2 * total,
            bytes_accessed=bytes_accessed,
        ),
    )(x2, t2)

    # Tiny epilogue reduction (num_blocks * 4 KiB) in plain XLA; divide by the
    # TRUE element count so padding/masking never biases the mean.
    return jnp.sum(partials) / jnp.float32(total)


def _reference(outputs, targets):
    x = outputs.astype(jnp.float32)
    t = targets.astype(jnp.float32)
    loss = jnp.maximum(x, 0.0) - x * t + jnp.log1p(jnp.exp(-jnp.abs(x)))
    return jnp.mean(loss)


if __name__ == "__main__":
    key = jax.random.PRNGKey(0)
    k1, k2, k3, k4 = jax.random.split(key, 4)

    # NCHW-style logits and binary targets: batch=2, channels=4, spatial=16x16
    outputs = jax.random.normal(k1, (2, 4, 16, 16), dtype=jnp.float32)
    targets = (jax.random.uniform(k2, (2, 4, 16, 16)) > 0.5).astype(jnp.float32)
    loss = binary_label_loss(outputs, targets)
    jax.block_until_ready(loss)
    ref = _reference(outputs, targets)
    assert jnp.allclose(loss, ref, atol=1e-5, rtol=1e-5), (loss, ref)

    # Non-multiple-of-128 size exercises the lane-pad + in-kernel tail mask.
    outputs2 = jax.random.normal(k3, (3, 5, 7), dtype=jnp.float32)
    targets2 = (jax.random.uniform(k4, (3, 5, 7)) > 0.5).astype(jnp.float32)
    loss2 = binary_label_loss(outputs2, targets2)
    jax.block_until_ready(loss2)
    ref2 = _reference(outputs2, targets2)
    assert jnp.allclose(loss2, ref2, atol=1e-5, rtol=1e-5), (loss2, ref2)

    # bf16 inputs exercise the dtype-aware sublane packing + row-pad path.
    outputs3 = jax.random.normal(k1, (4, 3, 40, 40), dtype=jnp.bfloat16)
    targets3 = (jax.random.uniform(k2, (4, 3, 40, 40)) > 0.5).astype(jnp.bfloat16)
    loss3 = binary_label_loss(outputs3, targets3)
    jax.block_until_ready(loss3)
    ref3 = _reference(outputs3, targets3)
    assert jnp.allclose(loss3, ref3, atol=1e-4, rtol=1e-4), (loss3, ref3)

    print("KERNEL_OK")
</pallas_src>

<mosaic_0001>
module attributes {stable_mosaic.version = 11 : i64} {
  func.func @_bce_partial_kernel(%arg0: i32, %arg1: memref<16x128xf32, #tpu.memory_space<vmem>>, %arg2: memref<16x128xf32, #tpu.memory_space<vmem>>, %arg3: memref<1x8x128xf32, #tpu.memory_space<vmem>>) attributes {dimension_semantics = [#tpu.dimension_semantics<parallel>], iteration_bounds = array<i64: 1>, scalar_prefetch = 0 : i64, scratch_operands = 0 : i64, tpu.core_type = #tpu.core_type<tc>, window_params = [{transform_indices = @transform_0, window_bounds = array<i64: 16, 128>}, {transform_indices = @transform_1, window_bounds = array<i64: 16, 128>}, {transform_indices = @transform_2, window_bounds = array<i64: 1, 8, 128>}]} {
    %c0 = arith.constant 0 : index
    %c0_0 = arith.constant 0 : index
    %0 = vector.load %arg1[%c0, %c0_0] : memref<16x128xf32, #tpu.memory_space<vmem>>, vector<16x128xf32>
    %c0_1 = arith.constant 0 : index
    %c0_2 = arith.constant 0 : index
    %1 = vector.load %arg2[%c0_1, %c0_2] : memref<16x128xf32, #tpu.memory_space<vmem>>, vector<16x128xf32>
    %cst = arith.constant 0.000000e+00 : f32
    %2 = vector.broadcast %cst : f32 to vector<16x128xf32>
    %3 = arith.maximumf %0, %2 : vector<16x128xf32>
    %4 = arith.mulf %0, %1 : vector<16x128xf32>
    %5 = arith.subf %3, %4 : vector<16x128xf32>
    %6 = math.absf %0 : vector<16x128xf32>
    %cst_3 = arith.constant 0.000000e+00 : f32
    %7 = vector.broadcast %cst_3 : f32 to vector<16x128xf32>
    %8 = arith.subf %7, %6 : vector<16x128xf32>
    %9 = math.exp %8 : vector<16x128xf32>
    %10 = math.log1p %9 : vector<16x128xf32>
    %11 = arith.addf %5, %10 : vector<16x128xf32>
    %c0_i32 = arith.constant 0 : i32
    %12 = arith.cmpi ne, %arg0, %c0_i32 : i32
    %13 = arith.extui %12 : i1 to i32
    %c0_i32_4 = arith.constant 0 : i32
    %14 = arith.cmpi ne, %13, %c0_i32_4 : i32
    scf.if %14 {
      %18 = vector.shape_cast %11 : vector<16x128xf32> to vector<1x2x8x128xf32>
      %cst_7 = arith.constant dense<0.000000e+00> : vector<1x8x128xf32>
      %19 = vector.multi_reduction <add>, %18, %cst_7 [1] : vector<1x2x8x128xf32> to vector<1x8x128xf32>
      %c0_8 = arith.constant 0 : index
      %c0_9 = arith.constant 0 : index
      %c0_10 = arith.constant 0 : index
      %20 = vector.load %arg3[%c0_8, %c0_9, %c0_10] : memref<1x8x128xf32, #tpu.memory_space<vmem>>, vector<1x8x128xf32>
      tpu.vector_store %arg3[%c0_8, %c0_9, %c0_10], %19 {strides = array<i32>} : memref<1x8x128xf32, #tpu.memory_space<vmem>>, vector<1x8x128xf32>,
    } else {
    }
    %c0_i32_5 = arith.constant 0 : i32
    %15 = arith.cmpi eq, %arg0, %c0_i32_5 : i32
    %16 = arith.extui %15 : i1 to i32
    %c0_i32_6 = arith.constant 0 : i32
    %17 = arith.cmpi ne, %16, %c0_i32_6 : i32
    scf.if %17 {
      %18 = tpu.iota {dimensions = array<i32: 0>} : vector<16x128xi32>
      %19 = tpu.iota {dimensions = array<i32: 1>} : vector<16x128xi32>
      %c16_i32 = arith.constant 16 : i32
      %20 = arith.muli %arg0, %c16_i32 : i32
      %21 = vector.broadcast %20 : i32 to vector<16x128xi32>
      %22 = arith.addi %21, %18 : vector<16x128xi32>
      %c128_i32 = arith.constant 128 : i32
      %23 = vector.broadcast %c128_i32 : i32 to vector<16x128xi32>
      %24 = arith.muli %22, %23 : vector<16x128xi32>
      %25 = arith.addi %24, %19 : vector<16x128xi32>
      %c2048_i32 = arith.constant 2048 : i32
      %26 = vector.broadcast %c2048_i32 : i32 to vector<16x128xi32>
      %27 = arith.cmpi slt, %25, %26 : vector<16x128xi32>
      %cst_7 = arith.constant 0.000000e+00 : f32
      %28 = vector.broadcast %cst_7 : f32 to vector<16x128xf32>
      %29 = arith.select %27, %11, %28 : vector<16x128xi1>, vector<16x128xf32>
      %30 = vector.shape_cast %29 : vector<16x128xf32> to vector<1x2x8x128xf32>
      %cst_8 = arith.constant dense<0.000000e+00> : vector<1x8x128xf32>
      %31 = vector.multi_reduction <add>, %30, %cst_8 [1] : vector<1x2x8x128xf32> to vector<1x8x128xf32>
      %c0_9 = arith.constant 0 : index
      %c0_10 = arith.constant 0 : index
      %c0_11 = arith.constant 0 : index
      %32 = vector.load %arg3[%c0_9, %c0_10, %c0_11] : memref<1x8x128xf32, #tpu.memory_space<vmem>>, vector<1x8x128xf32>
      tpu.vector_store %arg3[%c0_9, %c0_10, %c0_11], %31 {strides = array<i32>} : memref<1x8x128xf32, #tpu.memory_space<vmem>>, vector<1x8x128xf32>,
    } else {
    }
    return
  }
  func.func @transform_0(%arg0: i32) -> (i32, i32) {
    %c0_i32 = arith.constant 0 : i32
    %c0_i32_0 = arith.constant 0 : i32
    return %arg0, %c0_i32 : i32, i32
  }
  func.func @transform_1(%arg0: i32) -> (i32, i32) {
    %c0_i32 = arith.constant 0 : i32
    %c0_i32_0 = arith.constant 0 : i32
    return %arg0, %c0_i32 : i32, i32
  }
  func.func @transform_2(%arg0: i32) -> (i32, i32, i32) {
    %c0_i32 = arith.constant 0 : i32
    %c0_i32_0 = arith.constant 0 : i32
    %c0_i32_1 = arith.constant 0 : i32
    return %arg0, %c0_i32, %c0_i32_0 : i32, i32, i32
  }
}

</mosaic_0001>

<bundles_post_ra>
// kernel: tpu_custom_call.1
= control target key start
LH: loop header
LB: loop body
LE: loop exit
PB: predicated region body
PF: predicated region fallthrough
CT: control target
= control target key end

     0   :  { %7 = vsyncpa [#allocation3], 0  ;;  %s231_s0 = inlined_call_operand.hbm [shape: f32[16,128], index: 0, kind: input, shape index: {}]   ;;  %s232_s1 = inlined_call_operand.hbm [shape: f32[16,128], index: 1, kind: input, shape index: {}]   ;;  %s233_s2 = inlined_call_operand.hbm [shape: f32[1,8,128], index: 2, kind: output, shape index: {}]  }
   0x1   :  { %8 = vsyncpa [#allocation6], 0 }
   0x2   :  { %9 = vsyncpa [#allocation4], 0  ;;  %s202_s9 = smov [#allocation2]  }
   0x3   :  { %s15_s10 = sshll.u32 %s202_s9, 4  ;;  %s16_s10 = int_to_ptr.vmem [resolvable:$true] %s15_s10 }
   0x4   :  { %s144_s11 = scalar_lea.vmem %s16_s10, 256  ;;  %p149_p1 = scmp.lt.s32.totalorder %s16_s10, %s16_s10 }
   0x5   :  { %p145_p0 = scmp.ne.s32.totalorder %s16_s10, %s144_s11  ;;  %p150_p2 = scmp.lt.s32.totalorder %s144_s11, %s144_s11 }
   0x7   :  { %p151_p3 = por %p150_p2, %p149_p1 }
   0x9   :  { %p152_p4 = pnand %p151_p3, %p145_p0 }
   0xb   :  { %155 = shalt.err (!%p152_p4)
}
   0xc   :  { %s203_s12 = smov 128   ;;  %s204_s13 = smov 8  }
   0xd   :  { %21 = dma.hbm_to_vmem [thread:$0]  %s231_s0, 256, %s16_s10, [#allocation3], %s203_s12, %s203_s12, %s204_s13  }
   0xe   :  { %s205_s16 = smov [#allocation5]  }
   0xf   :  { %s27_s17 = sshll.u32 %s205_s16, 4  ;;  %s28_s17 = int_to_ptr.vmem [resolvable:$true] %s27_s17 }
  0x10   :  { %s164_s18 = scalar_lea.vmem %s28_s17, 256  ;;  %p169_p6 = scmp.lt.s32.totalorder %s28_s17, %s28_s17 }
  0x11   :  { %p165_p5 = scmp.ne.s32.totalorder %s28_s17, %s164_s18  ;;  %p170_p7 = scmp.lt.s32.totalorder %s164_s18, %s164_s18 }
  0x13   :  { %p171_p8 = por %p170_p7, %p169_p6 }
  0x15   :  { %p172_p9 = pnand %p171_p8, %p165_p5 }
  0x17   :  { %175 = shalt.err (!%p172_p9)
}
  0x18   :  { %33 = dma.hbm_to_vmem [thread:$0]  %s232_s1, 256, %s28_s17, [#allocation6], %s203_s12, %s203_s12, %s204_s13  }
  0x19   :  { %196 = dma.done.wait [#allocation3], 256  }
  0x1a   :  { %197 = vsyncadd [#allocation3], 4294967040 }
  0x1b   :  { %198 = dma.done.wait [#allocation6], 256  }
  0x1c   :  { %199 = vsyncadd [#allocation6], 4294967040  ;;  %v40_v0 = vld [vmem:[#allocation2] sm:$0xff]  ;;  %v41_v1 = vld [vmem:[#allocation2 + $0x8] sm:$0xff]  ;;  %v88_v8 = vlaneseq  ;;  %s206_s0 = smov [#allocation7]  }
  0x1d   :  { %v50_v2 = vand.u32 2147483647, %v40_v0  ;;  %v51_v3 = vand.u32 2147483647, %v41_v1  ;;  %v42_v17 = vld [vmem:[#allocation5] sm:$0xff]  ;;  %v43_v18 = vld [vmem:[#allocation5 + $0x8] sm:$0xff] }
  0x1e   :  { %v89_v13 = vshrl.u32 %v88_v8, 7  ;;  %v92_v20 = vand.u32 127, %v88_v8  ;;  %v44_v23 = vmax.f32 %v40_v0, 0.0  ;;  %v46_v24 = vmul.f32 %v42_v17, %v40_v0  ;;  %s113_s1 = sshll.u32 %s206_s0, 4  ;;  %s114_s1 = int_to_ptr.vmem [resolvable:$true] %s113_s1 }
  0x1f   :  { %v52_v4 = vsub.f32 0.0, %v50_v2  ;;  %v53_v5 = vsub.f32 0.0, %v51_v3  ;;  %v45_v27 = vmax.f32 %v41_v1, 0.0  ;;  %v47_v28 = vmul.f32 %v43_v18, %v41_v1  ;;  %s176_s21 = scalar_lea.vmem %s114_s1, 128  ;;  %p181_p11 = scmp.lt.s32.totalorder %s114_s1, %s114_s1 }
  0x20   :  { %v90_v15 = vadd.s32 8, %v89_v13  ;;  %v97_v21 = vmul.u32 128, %v89_v13  ;;  %v48_v33 = vsub.f32 %v44_v23, %v46_v24  ;;  %p177_p10 = scmp.ne.s32.totalorder %s114_s1, %s176_s21  ;;  %p182_p12 = scmp.lt.s32.totalorder %s176_s21, %s176_s21 }
  0x21   :  { %v54_v6 = vmul.f32 1.442695, %v52_v4  ;;  %v56_v7 = vmul.f32 1.442695, %v53_v5  ;;  %v49_v37 = vsub.f32 %v45_v27, %v47_v28 }
  0x22   :  { %v98_v22 = vmul.u32 128, %v90_v15  ;;  %v99_v31 = vadd.s32 %v97_v21, %v92_v20  ;;  %p183_p13 = por %p182_p12, %p181_p11 }
  0x23   :  { %128 = vpow2.f32 %v54_v6 }
  0x24   :  { %130 = vpow2.f32 %v56_v7  ;;  %v100_v35 = vadd.s32 %v98_v22, %v92_v20  ;;  %vm101_vm2 = vcmp.lt.s32.totalorder %v99_v31, 2048  ;;  %p184_p0 = pnand %p183_p13, %p177_p10 }
  0x26   :  { %vm102_vm3 = vcmp.lt.s32.totalorder %v100_v35, 2048 }
  0x30   :  { %v129_v9 = vpop.eup %128 }
  0x31   :  { %v131_v10 = vpop.eup %130  ;;  %v58_v11 = vadd.f32 1.0, %v129_v9  ;;  %v61_v14 = vmul.f32 -0.5, %v129_v9  ;;  %v64_v25 = vand.u32 2147483647, %v129_v9 }
  0x32   :  { %v67_v12 = vadd.f32 1.0, %v131_v10  ;;  %v70_v16 = vmul.f32 -0.5, %v131_v10  ;;  %v73_v29 = vand.u32 2147483647, %v131_v10 }
  0x33   :  { %132 = vlog2.f32 %v58_v11  ;;  %v62_v19 = vadd.f32 1.0, %v61_v14  ;;  %vm65_vm0 = vcmp.lt.f32.partialorder %v64_v25, 0.0004427343 }
  0x34   :  { %134 = vlog2.f32 %v67_v12  ;;  %v71_v26 = vadd.f32 1.0, %v70_v16  ;;  %vm74_vm1 = vcmp.lt.f32.partialorder %v73_v29, 0.0004427343 }
  0x35   :  { %v63_v30 = vmul.f32 %v129_v9, %v62_v19 }
  0x36   :  { %v72_v34 = vmul.f32 %v131_v10, %v71_v26 }
  0x40   :  { %v133_v32 = vpop.eup %132 }
  0x41   :  { %v135_v36 = vpop.eup %134  ;;  %v60_v38 = vmul.f32 0.6931472, %v133_v32 }
  0x42   :  { %v69_v39 = vmul.f32 0.6931472, %v135_v36 }
  0x43   :  { %v66_v40 = vsel %vm65_vm0, %v63_v30, %v60_v38 }
  0x44   :  { %v75_v41 = vsel %vm74_vm1, %v72_v34, %v69_v39  ;;  %v76_v42 = vadd.f32 %v66_v40, %v48_v33 }
  0x45   :  { %v77_v43 = vadd.f32 %v75_v41, %v49_v37 }
  0x46   :  { %v103_v44 = vsel %vm101_vm2, %v76_v42, 0.0 }
  0x47   :  { %v104_v45 = vsel %vm102_vm3, %v77_v43, 0.0 }
  0x48   :  { %v105_v46 = vadd.f32 %v104_v45, %v103_v44 }
  0x4a   :  { %106 = vst [vmem:[#allocation7] sm:$0xff] %v105_v46 }
  0x4b   :  { %187 = shalt.err (!%p184_p0)
}
  0x4c   :  { %116 = dma.vmem_to_hbm [thread:$0]  %s114_s1, 128, %s233_s2, [#allocation4]  }
  0x4d   :  { %200 = dma.done.wait [#allocation4], 128  }
  0x4e   :  { %201 = vsyncadd [#allocation4], 4294967168 }
  0x4f   :  { %120 = vsyncpa [#allocation3], 1 }
  0x50   :  { %121 = vsyncpa [#allocation6], 1 }
  0x51   :  { %122 = vsyncpa [#allocation4], 1 }

</bundles_post_ra>
